<compile_context>
chip_gen: v5e
topology: v5e:2x2
jax: 0.10.0
libtpu: 0.0.40
codegen_flags: <defaults>
</compile_context>

<pallas_src>
import functools
import numpy as np

import jax
import jax.numpy as jnp
from jax.experimental import pallas as pl
from jax.experimental.pallas import tpu as pltpu

BN_EPS = 1e-5


def _round_up(x, m):
    return ((x + m - 1) // m) * m


def _pick_tile(n, cands):
    """Largest candidate tile that divides n (n is a multiple of 128)."""
    for c in cands:
        if n % c == 0:
            return c
    return 128


# ----------------------------------------------------------------------------
# Fused matmul kernel:  (A @ B) * scale + shift  [+ add]  [+ ReLU]
#   A, B, add: bf16   scale/shift: f32   accumulation: f32   output: bf16
# ----------------------------------------------------------------------------
def _matmul_kernel(a_ref, b_ref, s_ref, t_ref, *rest, relu, has_add):
    if has_add:
        add_ref, o_ref, acc_ref = rest
    else:
        o_ref, acc_ref = rest

    @pl.when(pl.program_id(2) == 0)
    def _():
        acc_ref[...] = jnp.zeros_like(acc_ref)

    acc_ref[...] += jnp.dot(a_ref[...], b_ref[...],
                            preferred_element_type=jnp.float32)

    @pl.when(pl.program_id(2) == pl.num_programs(2) - 1)
    def _():
        r = acc_ref[...] * s_ref[...] + t_ref[...]
        if has_add:
            r = r + add_ref[...].astype(jnp.float32)
        if relu:
            r = jnp.maximum(r, 0.0)
        o_ref[...] = r.astype(o_ref.dtype)


def fused_matmul(a, wp, scale_p, shift_p, n_out, relu=False, add=None):
    """a: (M, K).  wp: (Kp, Np) bf16 pre-padded.  scale_p/shift_p: (1, Np) f32.
    add: optional (M, n_out) residual fused into the epilogue (before ReLU).
    Returns (M, n_out) bf16."""
    M, K = a.shape
    Kp, Np = wp.shape

    tk = _pick_tile(Kp, (512, 384, 256, 128))
    tn = _pick_tile(Np, (256, 128))
    tm = min(256, _round_up(M, 128))
    Mp = _round_up(M, tm)

    a = a.astype(jnp.bfloat16)
    if (Mp, Kp) != (M, K):
        a = jnp.zeros((Mp, Kp), jnp.bfloat16).at[:M, :K].set(a)

    inputs = [a, wp, scale_p, shift_p]
    in_specs = [
        pl.BlockSpec((tm, tk), lambda i, j, k: (i, k)),
        pl.BlockSpec((tk, tn), lambda i, j, k: (k, j)),
        pl.BlockSpec((1, tn), lambda i, j, k: (0, j)),
        pl.BlockSpec((1, tn), lambda i, j, k: (0, j)),
    ]
    has_add = add is not None
    if has_add:
        addp = add.astype(jnp.bfloat16)
        if addp.shape != (Mp, Np):
            addp = jnp.zeros((Mp, Np), jnp.bfloat16).at[:M, :n_out].set(addp)
        inputs.append(addp)
        in_specs.append(pl.BlockSpec((tm, tn), lambda i, j, k: (i, j)))

    grid = (Mp // tm, Np // tn, Kp // tk)
    out = pl.pallas_call(
        functools.partial(_matmul_kernel, relu=relu, has_add=has_add),
        out_shape=jax.ShapeDtypeStruct((Mp, Np), jnp.bfloat16),
        grid_spec=pltpu.PrefetchScalarGridSpec(
            num_scalar_prefetch=0,
            grid=grid,
            in_specs=in_specs,
            out_specs=pl.BlockSpec((tm, tn), lambda i, j, k: (i, j)),
            scratch_shapes=[pltpu.VMEM((tm, tn), jnp.float32)],
        ),
        compiler_params=pltpu.CompilerParams(
            dimension_semantics=("parallel", "parallel", "arbitrary")),
    )(*inputs)
    return out[:M, :n_out]


# ----------------------------------------------------------------------------
# Max-pool kernel (3x3, stride 2, pad 1, ceil_mode) — tiled over rows.
# ----------------------------------------------------------------------------
def _maxpool_kernel(x_ref, o_ref):
    r = x_ref[0]
    for i in range(1, 9):
        r = jnp.maximum(r, x_ref[i])
    o_ref[...] = r


def maxpool_3x3(x):
    """MaxPool2d(kernel=3, stride=2, padding=1, ceil_mode=True) on NHWC bf16."""
    B, H, W, C = x.shape
    k, s, p = 3, 2, 1

    def odim(n):
        o = -(-(n + 2 * p - k) // s) + 1          # ceil_mode
        if (o - 1) * s >= n + p:                  # last window must start in-bounds
            o -= 1
        return o

    Ho, Wo = odim(H), odim(W)
    ph = max((Ho - 1) * s + k - (H + p), 0)
    pw = max((Wo - 1) * s + k - (W + p), 0)
    xp = jnp.pad(x, ((0, 0), (p, ph), (p, pw), (0, 0)),
                 constant_values=float("-inf"))
    wins = [xp[:, i:i + (Ho - 1) * s + 1:s, j:j + (Wo - 1) * s + 1:s, :]
            for i in range(k) for j in range(k)]
    M = B * Ho * Wo
    stk = jnp.stack(wins, 0).reshape(9, M, C)

    Cp = _round_up(C, 128)
    TR = min(512, _round_up(M, 128))
    Mp = _round_up(M, TR)
    if (Mp, Cp) != (M, C):
        stk = jnp.zeros((9, Mp, Cp), x.dtype).at[:, :M, :C].set(stk)

    out = pl.pallas_call(
        _maxpool_kernel,
        out_shape=jax.ShapeDtypeStruct((Mp, Cp), x.dtype),
        grid=(Mp // TR,),
        in_specs=[pl.BlockSpec((9, TR, Cp), lambda i: (0, i, 0))],
        out_specs=pl.BlockSpec((TR, Cp), lambda i: (i, 0)),
        compiler_params=pltpu.CompilerParams(dimension_semantics=("parallel",)),
    )(stk)
    return out[:M, :C].reshape(B, Ho, Wo, C)


# ----------------------------------------------------------------------------
# Conv / upsample wrappers (glue is plain JAX; the matmul is the kernel)
# ----------------------------------------------------------------------------
def _im2col(x, kh, kw, stride, padding, dilation):
    B, H, W, C = x.shape
    Ho = (H + 2 * padding - dilation * (kh - 1) - 1) // stride + 1
    Wo = (W + 2 * padding - dilation * (kw - 1) - 1) // stride + 1
    xp = jnp.pad(x, ((0, 0), (padding, padding), (padding, padding), (0, 0)))
    cols = []
    for i in range(kh):
        for j in range(kw):
            cols.append(xp[:, i * dilation:i * dilation + (Ho - 1) * stride + 1:stride,
                           j * dilation:j * dilation + (Wo - 1) * stride + 1:stride, :])
    patches = jnp.concatenate(cols, axis=-1)
    return patches.reshape(B * Ho * Wo, kh * kw * C), Ho, Wo


def conv2d(x, cp, stride=1, padding=0, dilation=1, relu=False, add=None):
    """x: NHWC bf16.  cp: pre-padded conv param dict.  Fused scale/shift/add/ReLU."""
    B = x.shape[0]
    kh, kw, cout = cp['kh'], cp['kw'], cp['cout']
    if kh == 1 and kw == 1 and padding == 0 and dilation == 1:
        xs = x[:, ::stride, ::stride, :] if stride != 1 else x
        _, Ho, Wo, C = xs.shape
        a = xs.reshape(B * Ho * Wo, C)
    else:
        a, Ho, Wo = _im2col(x, kh, kw, stride, padding, dilation)
    add_m = None if add is None else add.reshape(B * Ho * Wo, cout)
    out = fused_matmul(a, cp['wp'], cp['scale'], cp['shift'], cout,
                       relu=relu, add=add_m)
    return out.reshape(B, Ho, Wo, cout)


def _interp_matrix(n_in, n_out):
    A = np.zeros((n_out, n_in), np.float32)
    if n_in == 1:
        A[:, 0] = 1.0
        return jnp.asarray(A)
    for i in range(n_out):
        src = 0.0 if n_out == 1 else i * (n_in - 1) / (n_out - 1)
        i0 = min(int(np.floor(src)), n_in - 1)
        i1 = min(i0 + 1, n_in - 1)
        w1 = src - i0
        A[i, i0] += 1.0 - w1
        A[i, i1] += w1
    return jnp.asarray(A)


def bilinear_upsample(x, Hout, Wout):
    """F.interpolate(mode='bilinear', align_corners=True) on NHWC via 2 matmuls."""
    B, H, W, C = x.shape
    wp_w, s_w, t_w = _pad_weight(_interp_matrix(W, Wout).T)   # (W, Wout)
    wp_h, s_h, t_h = _pad_weight(_interp_matrix(H, Hout).T)   # (H, Hout)
    xt = jnp.transpose(x, (0, 3, 1, 2)).reshape(B * C * H, W)
    y = fused_matmul(xt, wp_w, s_w, t_w, Wout)                # (B*C*H, Wout)
    y = y.reshape(B, C, H, Wout)
    yt = jnp.transpose(y, (0, 1, 3, 2)).reshape(B * C * Wout, H)
    z = fused_matmul(yt, wp_h, s_h, t_h, Hout)                # (B*C*Wout, Hout)
    z = z.reshape(B, C, Wout, Hout)
    return jnp.transpose(z, (0, 3, 2, 1))                     # (B, Hout, Wout, C)


# ----------------------------------------------------------------------------
# Parameter construction (padded weights built once at init)
# ----------------------------------------------------------------------------
def _bn_fold(c):
    # Fresh BatchNorm2d(affine=True): weight=1, bias=0, running_mean=0, running_var=1.
    gamma = jnp.ones((c,), jnp.float32)
    beta = jnp.zeros((c,), jnp.float32)
    mean = jnp.zeros((c,), jnp.float32)
    var = jnp.ones((c,), jnp.float32)
    scale = gamma / jnp.sqrt(var + BN_EPS)
    shift = beta - mean * scale
    return scale, shift


def _pad_weight(wm, scale=None, shift=None):
    """wm: (K, N) matmul weight.  Returns (Kp,Np) bf16, (1,Np) f32, (1,Np) f32."""
    K, N = wm.shape
    Kp, Np = _round_up(K, 128), _round_up(N, 128)
    wp = jnp.zeros((Kp, Np), jnp.bfloat16).at[:K, :N].set(wm.astype(jnp.bfloat16))
    if scale is None:
        scale = jnp.ones((N,), jnp.float32)
    if shift is None:
        shift = jnp.zeros((N,), jnp.float32)
    sp = jnp.zeros((1, Np), jnp.float32).at[0, :N].set(scale.astype(jnp.float32))
    tp = jnp.zeros((1, Np), jnp.float32).at[0, :N].set(shift.astype(jnp.float32))
    return wp, sp, tp


def _conv_param(key, cout, cin, kh, kw, bias=None):
    # module init: m.weight.data.normal_(0, 0.01)
    w = 0.01 * jax.random.normal(key, (cout, cin, kh, kw), jnp.float32)
    wm = jnp.transpose(w, (2, 3, 1, 0)).reshape(kh * kw * cin, cout)
    if bias is None:
        scale, shift = _bn_fold(cout)          # conv + folded eval-mode BN
    else:
        scale = jnp.ones((cout,), jnp.float32)  # conv with bias, no BN
        shift = bias
    wp, sp, tp = _pad_weight(wm, scale, shift)
    return {'kh': kh, 'kw': kw, 'cout': cout, 'wp': wp, 'scale': sp, 'shift': tp}


def init_params(key, layers, num_classes):
    keys = iter(jax.random.split(key, 256))
    P = {'conv1': _conv_param(next(keys), 64, 3, 7, 7)}
    inplanes = 64
    cfg = [(64, layers[0], 1, 1), (128, layers[1], 2, 1),
           (256, layers[2], 1, 2), (512, layers[3], 1, 4)]
    P['layers'] = []
    for planes, blocks, stride, dilation in cfg:
        blist = []
        for b in range(blocks):
            bstride = stride if b == 0 else 1
            blk = {
                'stride': bstride, 'dilation': dilation,
                'c1': _conv_param(next(keys), planes, inplanes, 1, 1),
                'c2': _conv_param(next(keys), planes, planes, 3, 3),
                'c3': _conv_param(next(keys), planes * 4, planes, 1, 1),
            }
            if b == 0 and (stride != 1 or inplanes != planes * 4
                           or dilation in (2, 4)):
                blk['ds'] = _conv_param(next(keys), planes * 4, inplanes, 1, 1)
            blist.append(blk)
            inplanes = planes * 4
        P['layers'].append(blist)

    def classifier(cin):
        branches = []
        for d in (6, 12, 18, 24):
            wkey, bkey = next(keys), next(keys)
            bias = 0.01 * jax.random.normal(bkey, (num_classes,), jnp.float32)
            branches.append({'cp': _conv_param(wkey, num_classes, cin, 3, 3, bias=bias),
                             'dilation': d})
        return branches

    P['layer5'] = classifier(1024)
    P['layer6'] = classifier(2048)
    return P


# ----------------------------------------------------------------------------
# Forward pass
# ----------------------------------------------------------------------------
def bottleneck_forward(x, blk):
    s, d = blk['stride'], blk['dilation']
    out = conv2d(x, blk['c1'], stride=s, relu=True)
    out = conv2d(out, blk['c2'], padding=d, dilation=d, relu=True)
    if 'ds' in blk:
        residual = conv2d(x, blk['ds'], stride=s)
    else:
        residual = x
    # residual add + ReLU fused into the last 1x1 conv's matmul epilogue
    return conv2d(out, blk['c3'], relu=True, add=residual)


def classifier_forward(x, branches):
    # Reproduces Classifier_Module.forward exactly, including the early `return`
    # inside its loop: only branches 0 (dil=6) and 1 (dil=12) contribute.
    b0, b1 = branches[0], branches[1]
    out0 = conv2d(x, b0['cp'], padding=b0['dilation'], dilation=b0['dilation'])
    # branch-0 output fused as the `add` operand of branch-1's matmul epilogue
    return conv2d(x, b1['cp'], padding=b1['dilation'], dilation=b1['dilation'],
                  add=out0)


def resnet_multi_forward(params, x_nchw):
    """x_nchw: (B, 3, H, W) f32 -> (x2, x1) both (B, num_classes, H, W) NCHW f32."""
    Hin, Win = x_nchw.shape[2], x_nchw.shape[3]
    x = jnp.transpose(x_nchw, (0, 2, 3, 1)).astype(jnp.bfloat16)   # NHWC bf16
    x = conv2d(x, params['conv1'], stride=2, padding=3, relu=True)
    x = maxpool_3x3(x)
    for blk in params['layers'][0]:
        x = bottleneck_forward(x, blk)
    for blk in params['layers'][1]:
        x = bottleneck_forward(x, blk)
    for blk in params['layers'][2]:
        x = bottleneck_forward(x, blk)

    x1 = classifier_forward(x, params['layer5'])
    x1 = bilinear_upsample(x1, Hin, Win)

    x2 = x
    for blk in params['layers'][3]:
        x2 = bottleneck_forward(x2, blk)
    x2 = classifier_forward(x2, params['layer6'])
    x2 = bilinear_upsample(x2, Hin, Win)

    to_out = lambda t: jnp.transpose(t, (0, 3, 1, 2)).astype(jnp.float32)
    return to_out(x2), to_out(x1)


if __name__ == "__main__":
    key = jax.random.PRNGKey(0)
    pkey, xkey = jax.random.split(key)

    layers = [1, 1, 1, 1]      # small block counts (DeepLab ResNet-101 uses [3,4,23,3])
    num_classes = 5
    params = init_params(pkey, layers, num_classes)

    x = jax.random.normal(xkey, (2, 3, 16, 16), jnp.float32)      # NCHW like PyTorch
    x2, x1 = resnet_multi_forward(params, x)
    jax.block_until_ready((x2, x1))

    assert x2.shape == (2, num_classes, 16, 16), x2.shape
    assert x1.shape == (2, num_classes, 16, 16), x1.shape
    assert bool(jnp.all(jnp.isfinite(x2))) and bool(jnp.all(jnp.isfinite(x1)))
    print("KERNEL_OK")
</pallas_src>

<mosaic_0001>
module attributes {stable_mosaic.version = 11 : i64} {
  func.func @_matmul_kernel(%arg0: i32, %arg1: i32, %arg2: i32, %arg3: memref<128x256xbf16, #tpu.memory_space<vmem>>, %arg4: memref<256x128xbf16, #tpu.memory_space<vmem>>, %arg5: memref<1x128xf32, #tpu.memory_space<vmem>>, %arg6: memref<1x128xf32, #tpu.memory_space<vmem>>, %arg7: memref<128x128xbf16, #tpu.memory_space<vmem>>, %arg8: memref<128x128xf32, #tpu.memory_space<vmem>>) attributes {dimension_semantics = [#tpu.dimension_semantics<parallel>, #tpu.dimension_semantics<parallel>, #tpu.dimension_semantics<arbitrary>], iteration_bounds = array<i64: 1, 1, 1>, scalar_prefetch = 0 : i64, scratch_operands = 1 : i64, tpu.core_type = #tpu.core_type<tc>, window_params = [{transform_indices = @transform_0, window_bounds = array<i64: 128, 256>}, {transform_indices = @transform_1, window_bounds = array<i64: 256, 128>}, {transform_indices = @transform_2, window_bounds = array<i64: 1, 128>}, {transform_indices = @transform_3, window_bounds = array<i64: 1, 128>}, {transform_indices = @transform_4, window_bounds = array<i64: 128, 128>}]} {
    %c0_i32 = arith.constant 0 : i32
    %0 = arith.cmpi eq, %arg2, %c0_i32 : i32
    %1 = arith.extui %0 : i1 to i32
    %c0_i32_0 = arith.constant 0 : i32
    %2 = arith.cmpi ne, %1, %c0_i32_0 : i32
    scf.if %2 {
      %cst_10 = arith.constant 0.000000e+00 : f32
      %12 = vector.broadcast %cst_10 : f32 to vector<128x128xf32>
      %c0_11 = arith.constant 0 : index
      %c0_12 = arith.constant 0 : index
      %13 = vector.load %arg8[%c0_11, %c0_12] : memref<128x128xf32, #tpu.memory_space<vmem>>, vector<128x128xf32>
      tpu.vector_store %arg8[%c0_11, %c0_12], %12 {strides = array<i32>} : memref<128x128xf32, #tpu.memory_space<vmem>>, vector<128x128xf32>,
    } else {
    }
    %c0 = arith.constant 0 : index
    %c0_1 = arith.constant 0 : index
    %3 = vector.load %arg8[%c0, %c0_1] : memref<128x128xf32, #tpu.memory_space<vmem>>, vector<128x128xf32>
    %c0_2 = arith.constant 0 : index
    %c0_3 = arith.constant 0 : index
    %4 = vector.load %arg3[%c0_2, %c0_3] : memref<128x256xbf16, #tpu.memory_space<vmem>>, vector<128x256xbf16>
    %c0_4 = arith.constant 0 : index
    %c0_5 = arith.constant 0 : index
    %5 = vector.load %arg4[%c0_4, %c0_5] : memref<256x128xbf16, #tpu.memory_space<vmem>>, vector<256x128xbf16>
    %cst = arith.constant dense<0.000000e+00> : vector<128x128xf32>
    %6 = tpu.matmul %4, %5, %cst {dimension_numbers = #tpu.dot_dimension_numbers<[1], [0], [0], [1], [0, 0, 1, 1], [], []>} : vector<128x256xbf16>, vector<256x128xbf16>, vector<128x128xf32> -> vector<128x128xf32>
    %7 = arith.addf %3, %6 : vector<128x128xf32>
    %c0_6 = arith.constant 0 : index
    %c0_7 = arith.constant 0 : index
    %8 = vector.load %arg8[%c0_6, %c0_7] : memref<128x128xf32, #tpu.memory_space<vmem>>, vector<128x128xf32>
    tpu.vector_store %arg8[%c0_6, %c0_7], %7 {strides = array<i32>} : memref<128x128xf32, #tpu.memory_space<vmem>>, vector<128x128xf32>,
    %c0_i32_8 = arith.constant 0 : i32
    %9 = arith.cmpi eq, %arg2, %c0_i32_8 : i32
    %10 = arith.extui %9 : i1 to i32
    %c0_i32_9 = arith.constant 0 : i32
    %11 = arith.cmpi ne, %10, %c0_i32_9 : i32
    scf.if %11 {
      %c0_10 = arith.constant 0 : index
      %c0_11 = arith.constant 0 : index
      %12 = vector.load %arg8[%c0_10, %c0_11] : memref<128x128xf32, #tpu.memory_space<vmem>>, vector<128x128xf32>
      %c0_12 = arith.constant 0 : index
      %c0_13 = arith.constant 0 : index
      %13 = vector.load %arg5[%c0_12, %c0_13] : memref<1x128xf32, #tpu.memory_space<vmem>>, vector<1x128xf32>
      %14 = vector.broadcast %13 : vector<1x128xf32> to vector<128x128xf32>
      %15 = arith.mulf %12, %14 : vector<128x128xf32>
      %c0_14 = arith.constant 0 : index
      %c0_15 = arith.constant 0 : index
      %16 = vector.load %arg6[%c0_14, %c0_15] : memref<1x128xf32, #tpu.memory_space<vmem>>, vector<1x128xf32>
      %17 = vector.broadcast %16 : vector<1x128xf32> to vector<128x128xf32>
      %18 = arith.addf %15, %17 : vector<128x128xf32>
      %cst_16 = arith.constant 0.000000e+00 : f32
      %19 = vector.broadcast %cst_16 : f32 to vector<128x128xf32>
      %20 = arith.maximumf %18, %19 : vector<128x128xf32>
      %21 = arith.truncf %20 : vector<128x128xf32> to vector<128x128xbf16>
      %c0_17 = arith.constant 0 : index
      %c0_18 = arith.constant 0 : index
      %22 = vector.load %arg7[%c0_17, %c0_18] : memref<128x128xbf16, #tpu.memory_space<vmem>>, vector<128x128xbf16>
      tpu.vector_store %arg7[%c0_17, %c0_18], %21 {strides = array<i32>} : memref<128x128xbf16, #tpu.memory_space<vmem>>, vector<128x128xbf16>,
    } else {
    }
    return
  }
  func.func @transform_0(%arg0: i32, %arg1: i32, %arg2: i32) -> (i32, i32) {
    %c0_i32 = arith.constant 0 : i32
    return %arg0, %arg2 : i32, i32
  }
  func.func @transform_1(%arg0: i32, %arg1: i32, %arg2: i32) -> (i32, i32) {
    %c0_i32 = arith.constant 0 : i32
    return %arg2, %arg1 : i32, i32
  }
  func.func @transform_2(%arg0: i32, %arg1: i32, %arg2: i32) -> (i32, i32) {
    %c0_i32 = arith.constant 0 : i32
    %c0_i32_0 = arith.constant 0 : i32
    return %c0_i32, %arg1 : i32, i32
  }
  func.func @transform_3(%arg0: i32, %arg1: i32, %arg2: i32) -> (i32, i32) {
    %c0_i32 = arith.constant 0 : i32
    %c0_i32_0 = arith.constant 0 : i32
    return %c0_i32, %arg1 : i32, i32
  }
  func.func @transform_4(%arg0: i32, %arg1: i32, %arg2: i32) -> (i32, i32) {
    %c0_i32 = arith.constant 0 : i32
    return %arg0, %arg1 : i32, i32
  }
}

</mosaic_0001>

<bundles_post_ra>
// kernel: tpu_custom_call.1
= control target key start
LH: loop header
LB: loop body
LE: loop exit
PB: predicated region body
PF: predicated region fallthrough
CT: control target
= control target key end

     0   :  { %9 = vsyncpa [#allocation4], 0  ;;  %s966_s0 = inlined_call_operand.hbm [shape: bf16[128,256], index: 0, kind: input, shape index: {}]   ;;  %s967_s1 = inlined_call_operand.hbm [shape: bf16[256,128], index: 1, kind: input, shape index: {}]   ;;  %s968_s2 = inlined_call_operand.vmem [shape: f32[1,128], index: 2, kind: input, shape index: {}]   ;;  %s969_s3 = inlined_call_operand.vmem [shape: f32[1,128], index: 3, kind: input, shape index: {}]   ;;  %s970_s4 = inlined_call_operand.hbm [shape: bf16[128,128], index: 4, kind: output, shape index: {}]  }
   0x1   :  { %10 = vsyncpa [#allocation7], 0 }
   0x2   :  { %11 = vsyncpa [#allocation5], 0  ;;  %s16_s17 = sshll.u32 %s966_s0, 4  ;;  %s877_s18 = smov [#allocation3]   ;;  %s17_s17 = int_to_ptr.hbm [resolvable:$true] %s16_s17 }
   0x3   :  { %s18_s19 = sshll.u32 %s877_s18, 4  ;;  %s29_s22 = sshll.u32 %s967_s1, 4  ;;  %s19_s19 = int_to_ptr.vmem [resolvable:$true] %s18_s19  ;;  %s30_s22 = int_to_ptr.hbm [resolvable:$true] %s29_s22 }
   0x4   :  { %s878_s23 = smov 128   ;;  %s879_s24 = smov 8  }
   0x5   :  { %24 = dma.hbm_to_vmem [thread:$0]  %s17_s17, 2048, %s19_s19, [#allocation4], %s878_s23, %s878_s23, %s879_s24  }
   0x6   :  { %s880_s25 = smov [#allocation6]   ;;  %s881_s27 = smov 64  }
   0x7   :  { %s31_s26 = sshll.u32 %s880_s25, 4  ;;  %s882_s28 = smov 4   ;;  %s32_s26 = int_to_ptr.vmem [resolvable:$true] %s31_s26 }
   0x8   :  { %37 = dma.hbm_to_vmem [thread:$0]  %s30_s22, 2048, %s32_s26, [#allocation7], %s881_s27, %s881_s27, %s882_s28  }
   0x9   :  { %871 = dma.done.wait [#allocation4], 2048  }
   0xa   :  { %872 = vsyncadd [#allocation4], 4294965248 }
   0xb   :  { %873 = dma.done.wait [#allocation7], 2048  }
   0xc   :  { %874 = vsyncadd [#allocation7], 4294965248  ;;  %v718_v0 = vld [vmem:[#allocation6 + $0x38] sm:$0xff]  ;;  %v717_v2 = vld [vmem:[#allocation6 + $0x30] sm:$0xff]  ;;  %s553_s7 = sshll.u32 %s970_s4, 4  ;;  %s554_s7 = int_to_ptr.hbm [resolvable:$true] %s553_s7 }
   0xd   :  { %v726_v1 = vld [vmem:[#allocation6 + $0x78] sm:$0xff]  ;;  %310 = vmatpush.bf16.msra.mxu0 %v718_v0  ;;  %774 = vmatpush.bf16.msra.mxu2 %v718_v0  ;;  %v725_v3 = vld [vmem:[#allocation6 + $0x70] sm:$0xff]  ;;  %v716_v4 = vld [vmem:[#allocation6 + $0x28] sm:$0xff] }
   0xe   :  { %359 = vmatpush.bf16.msra.mxu1 %v726_v1  ;;  %782 = vmatpush.bf16.msra.mxu3 %v726_v1  ;;  %v724_v5 = vld [vmem:[#allocation6 + $0x68] sm:$0xff]  ;;  %v715_v6 = vld [vmem:[#allocation6 + $0x20] sm:$0xff]  ;;  %v714_v8 = vld [vmem:[#allocation6 + $0x18] sm:$0xff] }
   0xf   :  { %v723_v7 = vld [vmem:[#allocation6 + $0x60] sm:$0xff]  ;;  %v722_v9 = vld [vmem:[#allocation6 + $0x58] sm:$0xff]  ;;  %v713_v10 = vld [vmem:[#allocation6 + $0x10] sm:$0xff] }
  0x10   :  { %v721_v11 = vld [vmem:[#allocation6 + $0x50] sm:$0xff]  ;;  %v712_v12 = vld [vmem:[#allocation6 + $0x8] sm:$0xff]  ;;  %v711_v14 = vld [vmem:[#allocation6] sm:$0xff] }
  0x11   :  { %311 = vmatpush.bf16.msra.mxu0 %v717_v2  ;;  %775 = vmatpush.bf16.msra.mxu2 %v717_v2  ;;  %v720_v13 = vld [vmem:[#allocation6 + $0x48] sm:$0xff]  ;;  %v719_v15 = vld [vmem:[#allocation6 + $0x40] sm:$0xff]  ;;  %v577_v28 = vld [vmem:[#allocation3 + $0x10] sm:$0xf] }
  0x12   :  { %360 = vmatpush.bf16.msra.mxu1 %v725_v3  ;;  %783 = vmatpush.bf16.msra.mxu3 %v725_v3  ;;  %v569_v16 = vld [vmem:[#allocation3] sm:$0xf]  ;;  %v696_v17 = vld [vmem:[#allocation3 + $0x4] sm:$0xf0]  ;;  %v695_v20 = vld [vmem:[#allocation3 + $0x4] sm:$0xf] }
  0x13   :  { %v601_v18 = vld [vmem:[#allocation3 + $0x40] sm:$0xf]  ;;  %v704_v19 = vld [vmem:[#allocation3 + $0x44] sm:$0xf0]  ;;  %v571_v21 = vld [vmem:[#allocation3 + $0x8] sm:$0xf0]  ;;  %v570_v24 = vor.u32 %v696_v17, %v569_v16 }
  0x14   :  { %v703_v22 = vld [vmem:[#allocation3 + $0x44] sm:$0xf]  ;;  %v603_v23 = vld [vmem:[#allocation3 + $0x48] sm:$0xf0]  ;;  %v602_v25 = vor.u32 %v704_v19, %v601_v18  ;;  %v574_v26 = vor.u32 %v695_v20, %v571_v21  ;;  %v698_v29 = vld [vmem:[#allocation3 + $0x14] sm:$0xf0] }
  0x15   :  { %312 = vmatpush.bf16.msra.mxu0 %v716_v4  ;;  %776 = vmatpush.bf16.msra.mxu2 %v716_v4  ;;  %v606_v27 = vor.u32 %v703_v22, %v603_v23  ;;  %v609_v30 = vld [vmem:[#allocation3 + $0x50] sm:$0xf]  ;;  %v706_v31 = vld [vmem:[#allocation3 + $0x54] sm:$0xf0]  ;;  %v697_v32 = vld [vmem:[#allocation3 + $0x14] sm:$0xf]  ;;  %v578_v36 = vor.u32 %v698_v29, %v577_v28 }
  0x16   :  { %361 = vmatpush.bf16.msra.mxu1 %v724_v5  ;;  %784 = vmatpush.bf16.msra.mxu3 %v724_v5  ;;  %v579_v33 = vld [vmem:[#allocation3 + $0x18] sm:$0xf0]  ;;  %v705_v34 = vld [vmem:[#allocation3 + $0x54] sm:$0xf]  ;;  %v610_v37 = vor.u32 %v706_v31, %v609_v30  ;;  %v585_v40 = vld [vmem:[#allocation3 + $0x20] sm:$0xf] }
  0x17   :  { %v611_v35 = vld [vmem:[#allocation3 + $0x58] sm:$0xf0]  ;;  %v582_v38 = vor.u32 %v697_v32, %v579_v33  ;;  %v700_v41 = vld [vmem:[#allocation3 + $0x24] sm:$0xf0]  ;;  %v617_v42 = vld [vmem:[#allocation3 + $0x60] sm:$0xf] }
  0x18   :  { %v614_v39 = vor.u32 %v705_v34, %v611_v35  ;;  %v708_v43 = vld [vmem:[#allocation3 + $0x64] sm:$0xf0]  ;;  %v699_v44 = vld [vmem:[#allocation3 + $0x24] sm:$0xf]  ;;  %v587_v45 = vld [vmem:[#allocation3 + $0x28] sm:$0xf0]  ;;  %v586_v48 = vor.u32 %v700_v41, %v585_v40 }
  0x19   :  { %313 = vmatpush.bf16.msra.mxu0 %v715_v6  ;;  %777 = vmatpush.bf16.msra.mxu2 %v715_v6  ;;  %v707_v46 = vld [vmem:[#allocation3 + $0x64] sm:$0xf]  ;;  %v619_v47 = vld [vmem:[#allocation3 + $0x68] sm:$0xf0]  ;;  %v618_v49 = vor.u32 %v708_v43, %v617_v42  ;;  %v590_v50 = vor.u32 %v699_v44, %v587_v45  ;;  %v593_v52 = vld [vmem:[#allocation3 + $0x30] sm:$0xf] }
  0x1a   :  { %362 = vmatpush.bf16.msra.mxu1 %v723_v7  ;;  %785 = vmatpush.bf16.msra.mxu3 %v723_v7  ;;  %v622_v51 = vor.u32 %v707_v46, %v619_v47  ;;  %v702_v53 = vld [vmem:[#allocation3 + $0x34] sm:$0xf0]  ;;  %v625_v54 = vld [vmem:[#allocation3 + $0x70] sm:$0xf]  ;;  %v701_v56 = vld [vmem:[#allocation3 + $0x34] sm:$0xf] }
  0x1b   :  { %v710_v55 = vld [vmem:[#allocation3 + $0x74] sm:$0xf0]  ;;  %v595_v57 = vld [vmem:[#allocation3 + $0x38] sm:$0xf0]  ;;  %v709_v58 = vld [vmem:[#allocation3 + $0x74] sm:$0xf]  ;;  %v594_v60 = vor.u32 %v702_v53, %v593_v52 }
  0x1c   :  { %v627_v59 = vld [vmem:[#allocation3 + $0x78] sm:$0xf0]  ;;  %v626_v61 = vor.u32 %v710_v55, %v625_v54  ;;  %v598_v62 = vor.u32 %v701_v56, %v595_v57  ;;  %v921_v3 = vld [vmem:[%s968_s2] ss:$0 sm:$0xff]  ;;  %s883_s2 = smov [#allocation8]  }
  0x1d   :  { %314 = vmatpush.bf16.msra.mxu0 %v714_v8  ;;  %778 = vmatpush.bf16.msra.mxu2 %v714_v8  ;;  %v630_v63 = vor.u32 %v709_v58, %v627_v59  ;;  %v927_v7 = vld [vmem:[%s969_s3] ss:$0 sm:$0xff]  ;;  %s551_s3 = sshll.u32 %s883_s2, 4  ;;  %s552_s3 = int_to_ptr.vmem [resolvable:$true] %s551_s3 }
  0x1e   :  { %363 = vmatpush.bf16.msra.mxu1 %v722_v9  ;;  %786 = vmatpush.bf16.msra.mxu3 %v722_v9 }
  0x21   :  { %315 = vmatpush.bf16.msra.mxu0 %v713_v10  ;;  %779 = vmatpush.bf16.msra.mxu2 %v713_v10 }
  0x22   :  { %364 = vmatpush.bf16.msra.mxu1 %v721_v11  ;;  %787 = vmatpush.bf16.msra.mxu3 %v721_v11 }
  0x25   :  { %316 = vmatpush.bf16.msra.mxu0 %v712_v12  ;;  %780 = vmatpush.bf16.msra.mxu2 %v712_v12 }
  0x26   :  { %365 = vmatpush.bf16.msra.mxu1 %v720_v13  ;;  %788 = vmatpush.bf16.msra.mxu3 %v720_v13 }
  0x29   :  { %317 = vmatpush.bf16.msra.mxu0 %v711_v14  ;;  %781 = vmatpush.bf16.msra.mxu2 %v711_v14 }
  0x2a   :  { %366 = vmatpush.bf16.msra.mxu1 %v719_v15  ;;  %789 = vmatpush.bf16.msra.mxu3 %v719_v15 }
  0x2c   :  { %318 = vmatmul.bf16.vlgmr.msra.gmra.mxu0 %v570_v24  ;;  %338 = vmatmul.bf16.vlgmr.msra.gmra.mxu2 %v602_v25 }
  0x2d   :  { %367 = vmatmul.bf16.vlgmr.msra.gmra.mxu1 %v574_v26  ;;  %387 = vmatmul.bf16.vlgmr.msra.gmra.mxu3 %v606_v27 }
  0x3c   :  { %323 = vmatmul.bf16.gmra.mxu0 %v578_v36  ;;  %343 = vmatmul.bf16.gmra.mxu2 %v610_v37 }
  0x3d   :  { %372 = vmatmul.bf16.gmra.mxu1 %v582_v38  ;;  %392 = vmatmul.bf16.gmra.mxu3 %v614_v39 }
  0x4c   :  { %328 = vmatmul.bf16.gmra.mxu0 %v586_v48  ;;  %348 = vmatmul.bf16.gmra.mxu2 %v618_v49 }
  0x4d   :  { %377 = vmatmul.bf16.gmra.mxu1 %v590_v50  ;;  %397 = vmatmul.bf16.gmra.mxu3 %v622_v51 }
  0x5c   :  { %333 = vmatmul.bf16.gmra.mxu0 %v594_v60  ;;  %353 = vmatmul.bf16.gmra.mxu2 %v626_v61 }
  0x5d   :  { %382 = vmatmul.bf16.gmra.mxu1 %v598_v62  ;;  %402 = vmatmul.bf16.gmra.mxu3 %v630_v63 }
  0xa9   :  { %v319_v0 = vpop.f32.mrf.mxu0 }
  0xaa   :  { %v368_v1 = vpop.f32.mrf.mxu1 }
  0xab   :  { %v369_v2 = vadd.f32 %v368_v1, %v319_v0 }
  0xad   :  { %v463_v6 = vmul.f32 %v921_v3, %v369_v2 }
  0xaf   :  { %v339_v4 = vpop.f32.mrf.mxu2  ;;  %v483_v12 = vadd.f32 %v927_v7, %v463_v6 }
  0xb0   :  { %v388_v5 = vpop.f32.mrf.mxu3 }
  0xb1   :  { %v321_v8 = vpop.f32.mrf.mxu0  ;;  %v389_v10 = vadd.f32 %v388_v5, %v339_v4  ;;  %v499_v18 = vmax.f32 %v483_v12, 0.0 }
  0xb2   :  { %v370_v9 = vpop.f32.mrf.mxu1 }
  0xb3   :  { %v371_v11 = vadd.f32 %v370_v9, %v321_v8  ;;  %v471_v14 = vmul.f32 %v921_v3, %v389_v10 }
  0xb5   :  { %v464_v13 = vmul.f32 %v921_v3, %v371_v11  ;;  %v491_v23 = vadd.f32 %v927_v7, %v471_v14 }
  0xb7   :  { %v484_v15 = vadd.f32 %v927_v7, %v464_v13  ;;  %v341_v16 = vpop.f32.mrf.mxu2  ;;  %v507_v28 = vmax.f32 %v491_v23, 0.0 }
  0xb8   :  { %v390_v17 = vpop.f32.mrf.mxu3 }
  0xb9   :  { %v500_v19 = vmax.f32 %v484_v15, 0.0  ;;  %v391_v20 = vadd.f32 %v390_v17, %v341_v16  ;;  %v324_v21 = vpop.f32.mrf.mxu0 }
  0xba   :  { %v373_v22 = vpop.f32.mrf.mxu1 }
  0xbb   :  { %v730_v24 = vpack.c.bf16 %v500_v19, %v499_v18  ;;  %v472_v25 = vmul.f32 %v921_v3, %v391_v20  ;;  %v374_v27 = vadd.f32 %v373_v22, %v324_v21 }
  0xbd   :  { %731 = vst [vmem:[#allocation8] sm:$0xff] %v730_v24   ;;  %v492_v26 = vadd.f32 %v927_v7, %v472_v25  ;;  %v465_v33 = vmul.f32 %v921_v3, %v374_v27 }
  0xbf   :  { %v508_v29 = vmax.f32 %v492_v26, 0.0  ;;  %v344_v30 = vpop.f32.mrf.mxu2  ;;  %v485_v38 = vadd.f32 %v927_v7, %v465_v33 }
  0xc0   :  { %v393_v31 = vpop.f32.mrf.mxu3 }
  0xc1   :  { %v750_v32 = vpack.c.bf16 %v508_v29, %v507_v28  ;;  %v326_v34 = vpop.f32.mrf.mxu0  ;;  %v394_v36 = vadd.f32 %v393_v31, %v344_v30  ;;  %v501_v44 = vmax.f32 %v485_v38, 0.0 }
  0xc2   :  { %v375_v35 = vpop.f32.mrf.mxu1 }
  0xc3   :  { %770 = vst [vmem:[#allocation8 + $0x20] sm:$0xff] %v750_v32   ;;  %v376_v37 = vadd.f32 %v375_v35, %v326_v34  ;;  %v473_v40 = vmul.f32 %v921_v3, %v394_v36 }
  0xc5   :  { %v466_v39 = vmul.f32 %v921_v3, %v376_v37  ;;  %v493_v49 = vadd.f32 %v927_v7, %v473_v40 }
  0xc7   :  { %v486_v41 = vadd.f32 %v927_v7, %v466_v39  ;;  %v346_v42 = vpop.f32.mrf.mxu2  ;;  %v509_v54 = vmax.f32 %v493_v49, 0.0 }
  0xc8   :  { %v395_v43 = vpop.f32.mrf.mxu3 }
  0xc9   :  { %v502_v45 = vmax.f32 %v486_v41, 0.0  ;;  %v396_v46 = vadd.f32 %v395_v43, %v346_v42  ;;  %v329_v47 = vpop.f32.mrf.mxu0 }
  0xca   :  { %v378_v48 = vpop.f32.mrf.mxu1 }
  0xcb   :  { %v735_v50 = vpack.c.bf16 %v502_v45, %v501_v44  ;;  %v474_v51 = vmul.f32 %v921_v3, %v396_v46  ;;  %v379_v53 = vadd.f32 %v378_v48, %v329_v47 }
  0xcd   :  { %767 = vst [vmem:[#allocation8 + $0x8] sm:$0xff] %v735_v50   ;;  %v494_v52 = vadd.f32 %v927_v7, %v474_v51  ;;  %v467_v59 = vmul.f32 %v921_v3, %v379_v53 }
  0xcf   :  { %v510_v55 = vmax.f32 %v494_v52, 0.0  ;;  %v349_v56 = vpop.f32.mrf.mxu2  ;;  %v487_v0 = vadd.f32 %v927_v7, %v467_v59 }
  0xd0   :  { %v398_v57 = vpop.f32.mrf.mxu3 }
  0xd1   :  { %v755_v58 = vpack.c.bf16 %v510_v55, %v509_v54  ;;  %v331_v60 = vpop.f32.mrf.mxu0  ;;  %v399_v62 = vadd.f32 %v398_v57, %v349_v56  ;;  %v503_v8 = vmax.f32 %v487_v0, 0.0 }
  0xd2   :  { %v380_v61 = vpop.f32.mrf.mxu1 }
  0xd3   :  { %771 = vst [vmem:[#allocation8 + $0x28] sm:$0xff] %v755_v58   ;;  %v381_v63 = vadd.f32 %v380_v61, %v331_v60  ;;  %v475_v2 = vmul.f32 %v921_v3, %v399_v62 }
  0xd5   :  { %v468_v1 = vmul.f32 %v921_v3, %v381_v63  ;;  %v495_v13 = vadd.f32 %v927_v7, %v475_v2 }
  0xd7   :  { %v488_v4 = vadd.f32 %v927_v7, %v468_v1  ;;  %v351_v5 = vpop.f32.mrf.mxu2  ;;  %v511_v18 = vmax.f32 %v495_v13, 0.0 }
  0xd8   :  { %v400_v6 = vpop.f32.mrf.mxu3 }
  0xd9   :  { %v504_v9 = vmax.f32 %v488_v4, 0.0  ;;  %v401_v10 = vadd.f32 %v400_v6, %v351_v5  ;;  %v334_v11 = vpop.f32.mrf.mxu0 }
  0xda   :  { %v383_v12 = vpop.f32.mrf.mxu1 }
  0xdb   :  { %v740_v14 = vpack.c.bf16 %v504_v9, %v503_v8  ;;  %v476_v15 = vmul.f32 %v921_v3, %v401_v10  ;;  %v384_v17 = vadd.f32 %v383_v12, %v334_v11 }
  0xdd   :  { %768 = vst [vmem:[#allocation8 + $0x10] sm:$0xff] %v740_v14   ;;  %v496_v16 = vadd.f32 %v927_v7, %v476_v15  ;;  %v469_v23 = vmul.f32 %v921_v3, %v384_v17 }
  0xdf   :  { %v512_v19 = vmax.f32 %v496_v16, 0.0  ;;  %v354_v20 = vpop.f32.mrf.mxu2  ;;  %v489_v28 = vadd.f32 %v927_v7, %v469_v23 }
  0xe0   :  { %v403_v21 = vpop.f32.mrf.mxu3 }
  0xe1   :  { %v760_v22 = vpack.c.bf16 %v512_v19, %v511_v18  ;;  %v336_v24 = vpop.f32.mrf.mxu0  ;;  %v404_v26 = vadd.f32 %v403_v21, %v354_v20  ;;  %v505_v34 = vmax.f32 %v489_v28, 0.0 }
  0xe2   :  { %v385_v25 = vpop.f32.mrf.mxu1 }
  0xe3   :  { %772 = vst [vmem:[#allocation8 + $0x30] sm:$0xff] %v760_v22   ;;  %v386_v27 = vadd.f32 %v385_v25, %v336_v24  ;;  %v477_v30 = vmul.f32 %v921_v3, %v404_v26 }
  0xe5   :  { %v470_v29 = vmul.f32 %v921_v3, %v386_v27  ;;  %v497_v37 = vadd.f32 %v927_v7, %v477_v30 }
  0xe7   :  { %v490_v31 = vadd.f32 %v927_v7, %v470_v29  ;;  %v356_v32 = vpop.f32.mrf.mxu2  ;;  %v513_v41 = vmax.f32 %v497_v37, 0.0 }
  0xe8   :  { %v405_v33 = vpop.f32.mrf.mxu3 }
  0xe9   :  { %v506_v35 = vmax.f32 %v490_v31, 0.0  ;;  %v406_v36 = vadd.f32 %v405_v33, %v356_v32 }
  0xeb   :  { %v745_v38 = vpack.c.bf16 %v506_v35, %v505_v34  ;;  %v478_v39 = vmul.f32 %v921_v3, %v406_v36 }
  0xed   :  { %769 = vst [vmem:[#allocation8 + $0x18] sm:$0xff] %v745_v38   ;;  %v498_v40 = vadd.f32 %v927_v7, %v478_v39 }
  0xef   :  { %v514_v42 = vmax.f32 %v498_v40, 0.0 }
  0xf1   :  { %v765_v43 = vpack.c.bf16 %v514_v42, %v513_v41 }
  0xf3   :  { %773 = vst [vmem:[#allocation8 + $0x38] sm:$0xff] %v765_v43  }
  0xf4   :  { %559 = dma.vmem_to_hbm [thread:$0]  %s552_s3, 1024, %s554_s7, [#allocation5], %s881_s27, %s881_s27, %s882_s28  }
  0xf5   :  { %875 = dma.done.wait [#allocation5], 1024  }
  0xf6   :  { %876 = vsyncadd [#allocation5], 4294966272 }
  0xf7   :  { %564 = vsyncpa [#allocation4], 1 }
  0xf8   :  { %565 = vsyncpa [#allocation7], 1 }
  0xf9   :  { %566 = vsyncpa [#allocation5], 1 }

</bundles_post_ra>
